<compile_context>
chip_gen: v7x
topology: tpu7x:2x2x1
jax: 0.10.0
libtpu: 0.0.40
codegen_flags: <defaults>
</compile_context>

<pallas_src>
import jax
import jax.numpy as jnp
from jax.experimental import pallas as pl
from jax.experimental.pallas import tpu as pltpu

_LANE = 128
_SUBLANE = 8


def _cdiv(a, b):
    return -(-a // b)


def _f32(x):
    # Only emit a cast when the input is not already f32 (keeps the bundle
    # clean for f32, enables a bf16-in-HBM option on v6e/v7x).
    return x if x.dtype == jnp.float32 else x.astype(jnp.float32)


def _vlv_kernel(q_mu_ref, log_sigma_ref, p_mu_ref, inv_p_ref, eps_ref,
                sample_ref, kl_ref):
    """Elementwise rsample + per-block KL partial sum (constants folded out)."""
    q_mu = _f32(q_mu_ref[...])
    log_sigma = _f32(log_sigma_ref[...])
    p_mu = _f32(p_mu_ref[...])
    inv_p = _f32(inv_p_ref[...])
    eps = _f32(eps_ref[...])

    sigma = jnp.exp(log_sigma)                                  # single EUP op
    # --- rsample ------------------------------------------------------------
    sample_ref[...] = (q_mu + sigma * eps).astype(sample_ref.dtype)
    # --- KL( N(q_mu, sigma) || N(p_mu, p_scale) ), p_scale = prior *variance*
    # Full per-element KL:
    #   0.5*((sigma*inv_p)^2 + ((q_mu-p_mu)*inv_p)^2 - 1) - log_sigma - log(inv_p)
    # The "-0.5 - log(inv_p)" part is constant module state and is added in the
    # wrapper (computed over the real, unpadded elements only).  Padded
    # elements (all zeros, inv_p = 0) contribute exactly 0 here.
    s_over_p = sigma * inv_p
    diff = (q_mu - p_mu) * inv_p
    kl_elem = 0.5 * (s_over_p * s_over_p + diff * diff) - log_sigma
    kl_ref[0, 0] = jnp.sum(kl_elem)                             # scalar -> SMEM


def _choose_block_rows(rows, target_block_rows):
    """Tail-aware block sizing; guarantees grid >= 2 when splittable (v7x)."""
    if rows <= _SUBLANE:
        return _SUBLANE
    n_blocks = max(1, _cdiv(rows, target_block_rows))
    if n_blocks == 1 and rows >= 2 * _SUBLANE:
        n_blocks = 2                       # let both v7x TensorCores get work
    block_rows = _cdiv(_cdiv(rows, n_blocks), _SUBLANE) * _SUBLANE
    return max(_SUBLANE, block_rows)


def prepare_vlv_state(q_mu, q_log_sigma, prior_loc, prior_var, data_dim, *,
                      target_block_rows=1024):
    """One-time 'module init': lane-dense slabs + folded KL constant.

    Called once; the returned state is reused by every forward call so the
    per-call path never pads / re-lays-out the parameter or prior streams.
    """
    n, latent_dim = q_mu.shape
    total = n * latent_dim

    rows = _cdiv(_cdiv(total, _LANE), _SUBLANE) * _SUBLANE
    block_rows = _choose_block_rows(rows, target_block_rows)
    grid = _cdiv(rows, block_rows)
    rows_padded = grid * block_rows
    total_padded = rows_padded * _LANE

    def slab(x, fill):
        flat = jnp.ravel(x)
        if total_padded != total:
            flat = jnp.pad(flat, (0, total_padded - total), constant_values=fill)
        return flat.reshape(rows_padded, _LANE)

    # Prior is static module state: fold the reciprocal once (removes two
    # per-element EUP divides from the kernel, keeps exact numerics).
    inv_p = 1.0 / prior_var
    # Folded constant over the REAL elements only:
    #   sum_i ( -log(inv_p_i) - 0.5 ) = sum(log(prior_var)) - 0.5 * total
    kl_const = jnp.sum(jnp.log(prior_var.astype(jnp.float32))) - 0.5 * total

    return dict(
        n=n, latent_dim=latent_dim, data_dim=data_dim, total=total,
        rows_padded=rows_padded, block_rows=block_rows, grid=grid,
        q_mu_slab=slab(q_mu, 0.0),
        q_log_sigma_slab=slab(q_log_sigma, 0.0),
        p_mu_slab=slab(prior_loc, 0.0),
        inv_p_slab=slab(inv_p, 0.0),          # pad=0 -> padded KL contribution 0
        kl_const=kl_const,
        out_dtype=q_mu.dtype,
    )


def sample_eps_slab(state, key):
    """Draw N(0,1) noise directly in the lane-dense slab layout (no pad copy)."""
    return jax.random.normal(key, (state["rows_padded"], _LANE),
                             dtype=jnp.float32)


def vlv_forward(state, eps_slab):
    """Returns (rsample of shape (n, latent_dim), scalar kl_loss)."""
    grid = state["grid"]
    block_rows = state["block_rows"]
    rows_padded = state["rows_padded"]
    n, latent_dim, data_dim = state["n"], state["latent_dim"], state["data_dim"]
    total = state["total"]

    vmem_spec = pl.BlockSpec((block_rows, _LANE), lambda i: (i, 0))
    elems = rows_padded * _LANE
    cost = pl.CostEstimate(
        flops=10 * elems,                 # elementwise adds/muls per element
        transcendentals=elems,            # one exp per element
        bytes_accessed=6 * elems * 4,     # 5 f32 input streams + 1 output
    )

    sample_slab, kl_parts = pl.pallas_call(
        _vlv_kernel,
        grid=(grid,),
        in_specs=[vmem_spec] * 5,
        out_specs=(
            vmem_spec,                                        # lane-dense sample
            pl.BlockSpec((1, 1), lambda i: (0, i),
                         memory_space=pltpu.SMEM),            # scalar KL partials
        ),
        out_shape=(
            jax.ShapeDtypeStruct((rows_padded, _LANE), state["out_dtype"]),
            jax.ShapeDtypeStruct((1, grid), jnp.float32),
        ),
        compiler_params=pltpu.CompilerParams(
            dimension_semantics=("parallel",)),
        cost_estimate=cost,
    )(state["q_mu_slab"], state["q_log_sigma_slab"], state["p_mu_slab"],
      state["inv_p_slab"], eps_slab)

    if rows_padded * _LANE == total:
        sample = sample_slab.reshape(n, latent_dim)           # free re-layout
    else:
        sample = sample_slab.reshape(-1)[:total].reshape(n, latent_dim)

    # Tiny final reduce (`grid` floats) + folded constant + /(n*data_dim).
    kl_loss = (jnp.sum(kl_parts) + state["kl_const"]) / (n * data_dim)
    return sample, kl_loss


def _reference(q_mu, q_log_sigma, prior_loc, prior_var, eps, data_dim):
    sigma = jnp.exp(q_log_sigma)
    sample = q_mu + sigma * eps
    p_scale = prior_var                        # module quirk: variance as scale
    var_ratio = (sigma / p_scale) ** 2
    t1 = ((q_mu - prior_loc) / p_scale) ** 2
    kl = 0.5 * (var_ratio + t1 - 1.0 - jnp.log(var_ratio))
    loss = kl.sum(axis=0).sum() / q_mu.shape[0] / data_dim
    return sample, loss


def _run_case(n, data_dim, latent_dim, seed):
    key = jax.random.PRNGKey(seed)
    k_init, k_logsig, k_pvar, k_eps = jax.random.split(key, 4)

    X_init = jax.random.normal(k_init, (n, latent_dim), dtype=jnp.float32)
    q_log_sigma = jax.random.normal(k_logsig, (n, latent_dim), dtype=jnp.float32)
    prior_loc = jnp.zeros((n, latent_dim), dtype=jnp.float32)
    prior_var = (jnp.abs(jax.random.normal(k_pvar, (n, latent_dim))) + 0.5
                 ).astype(jnp.float32)

    state = prepare_vlv_state(X_init, q_log_sigma, prior_loc, prior_var, data_dim)
    eps_slab = sample_eps_slab(state, k_eps)
    sample, kl_loss = vlv_forward(state, eps_slab)
    jax.block_until_ready((sample, kl_loss))

    eps = eps_slab.reshape(-1)[:state["total"]].reshape(n, latent_dim)
    ref_sample, ref_kl = _reference(X_init, q_log_sigma, prior_loc, prior_var,
                                    eps, data_dim)
    assert sample.shape == (n, latent_dim)
    assert jnp.allclose(sample, ref_sample, atol=1e-5, rtol=1e-5)
    assert jnp.allclose(kl_loss, ref_kl, atol=1e-4, rtol=5e-5)


if __name__ == "__main__":
    # Module hyperparameters (small, consistent with __init__ signature).
    _run_case(n=16, data_dim=12, latent_dim=8, seed=0)
    # Second case exercises grid > 1 (two blocks) and tail padding.
    _run_case(n=300, data_dim=10, latent_dim=6, seed=1)
    print("KERNEL_OK")
</pallas_src>

<mosaic_0001>
module attributes {stable_mosaic.version = 11 : i64} {
  func.func @_vlv_kernel(%arg0: i32, %arg1: memref<8x128xf32, #tpu.memory_space<vmem>>, %arg2: memref<8x128xf32, #tpu.memory_space<vmem>>, %arg3: memref<8x128xf32, #tpu.memory_space<vmem>>, %arg4: memref<8x128xf32, #tpu.memory_space<vmem>>, %arg5: memref<8x128xf32, #tpu.memory_space<vmem>>, %arg6: memref<8x128xf32, #tpu.memory_space<vmem>>, %arg7: memref<1x1xf32, #tpu.memory_space<smem>>) attributes {dimension_semantics = [#tpu.dimension_semantics<parallel>], iteration_bounds = array<i64: 1>, scalar_prefetch = 0 : i64, scratch_operands = 0 : i64, tpu.core_type = #tpu.core_type<tc>, window_params = [{transform_indices = @transform_0, window_bounds = array<i64: 8, 128>}, {transform_indices = @transform_1, window_bounds = array<i64: 8, 128>}, {transform_indices = @transform_2, window_bounds = array<i64: 8, 128>}, {transform_indices = @transform_3, window_bounds = array<i64: 8, 128>}, {transform_indices = @transform_4, window_bounds = array<i64: 8, 128>}, {transform_indices = @transform_5, window_bounds = array<i64: 8, 128>}, {transform_indices = @transform_6, window_bounds = array<i64: 1, 1>}]} {
    %c0 = arith.constant 0 : index
    %c0_0 = arith.constant 0 : index
    %0 = vector.load %arg1[%c0, %c0_0] : memref<8x128xf32, #tpu.memory_space<vmem>>, vector<8x128xf32>
    %c0_1 = arith.constant 0 : index
    %c0_2 = arith.constant 0 : index
    %1 = vector.load %arg2[%c0_1, %c0_2] : memref<8x128xf32, #tpu.memory_space<vmem>>, vector<8x128xf32>
    %c0_3 = arith.constant 0 : index
    %c0_4 = arith.constant 0 : index
    %2 = vector.load %arg3[%c0_3, %c0_4] : memref<8x128xf32, #tpu.memory_space<vmem>>, vector<8x128xf32>
    %c0_5 = arith.constant 0 : index
    %c0_6 = arith.constant 0 : index
    %3 = vector.load %arg4[%c0_5, %c0_6] : memref<8x128xf32, #tpu.memory_space<vmem>>, vector<8x128xf32>
    %c0_7 = arith.constant 0 : index
    %c0_8 = arith.constant 0 : index
    %4 = vector.load %arg5[%c0_7, %c0_8] : memref<8x128xf32, #tpu.memory_space<vmem>>, vector<8x128xf32>
    %5 = math.exp %1 : vector<8x128xf32>
    %6 = arith.mulf %5, %4 : vector<8x128xf32>
    %7 = arith.addf %0, %6 : vector<8x128xf32>
    %c0_9 = arith.constant 0 : index
    %c0_10 = arith.constant 0 : index
    %8 = vector.load %arg6[%c0_9, %c0_10] : memref<8x128xf32, #tpu.memory_space<vmem>>, vector<8x128xf32>
    tpu.vector_store %arg6[%c0_9, %c0_10], %7 {strides = array<i32>} : memref<8x128xf32, #tpu.memory_space<vmem>>, vector<8x128xf32>,
    %9 = arith.mulf %5, %3 : vector<8x128xf32>
    %10 = arith.subf %0, %2 : vector<8x128xf32>
    %11 = arith.mulf %10, %3 : vector<8x128xf32>
    %12 = arith.mulf %9, %9 : vector<8x128xf32>
    %13 = arith.mulf %11, %11 : vector<8x128xf32>
    %14 = arith.addf %12, %13 : vector<8x128xf32>
    %cst = arith.constant 5.000000e-01 : f32
    %15 = vector.broadcast %cst : f32 to vector<8x128xf32>
    %16 = arith.mulf %15, %14 : vector<8x128xf32>
    %17 = arith.subf %16, %1 : vector<8x128xf32>
    %18 = vector.shape_cast %17 : vector<8x128xf32> to vector<1x8x128xf32>
    %cst_11 = arith.constant dense<0.000000e+00> : vector<1xf32>
    %19 = vector.multi_reduction <add>, %18, %cst_11 [1, 2] : vector<1x8x128xf32> to vector<1xf32>
    %20 = vector.shape_cast %19 : vector<1xf32> to vector<1x1x1xf32>
    %21 = vector.extract %20[0, 0, 0] : f32 from vector<1x1x1xf32>
    %c0_12 = arith.constant 0 : index
    %c0_13 = arith.constant 0 : index
    %22 = memref.load %arg7[%c0_12, %c0_13] : memref<1x1xf32, #tpu.memory_space<smem>>
    memref.store %21, %arg7[%c0_12, %c0_13] : memref<1x1xf32, #tpu.memory_space<smem>>
    return
  }
  func.func @transform_0(%arg0: i32) -> (i32, i32) {
    %c0_i32 = arith.constant 0 : i32
    %c0_i32_0 = arith.constant 0 : i32
    return %arg0, %c0_i32 : i32, i32
  }
  func.func @transform_1(%arg0: i32) -> (i32, i32) {
    %c0_i32 = arith.constant 0 : i32
    %c0_i32_0 = arith.constant 0 : i32
    return %arg0, %c0_i32 : i32, i32
  }
  func.func @transform_2(%arg0: i32) -> (i32, i32) {
    %c0_i32 = arith.constant 0 : i32
    %c0_i32_0 = arith.constant 0 : i32
    return %arg0, %c0_i32 : i32, i32
  }
  func.func @transform_3(%arg0: i32) -> (i32, i32) {
    %c0_i32 = arith.constant 0 : i32
    %c0_i32_0 = arith.constant 0 : i32
    return %arg0, %c0_i32 : i32, i32
  }
  func.func @transform_4(%arg0: i32) -> (i32, i32) {
    %c0_i32 = arith.constant 0 : i32
    %c0_i32_0 = arith.constant 0 : i32
    return %arg0, %c0_i32 : i32, i32
  }
  func.func @transform_5(%arg0: i32) -> (i32, i32) {
    %c0_i32 = arith.constant 0 : i32
    %c0_i32_0 = arith.constant 0 : i32
    return %arg0, %c0_i32 : i32, i32
  }
  func.func @transform_6(%arg0: i32) -> (i32, i32) {
    %c0_i32 = arith.constant 0 : i32
    %c0_i32_0 = arith.constant 0 : i32
    return %c0_i32, %arg0 : i32, i32
  }
}

</mosaic_0001>

<bundles_post_ra>
// kernel: tpu_custom_call.1
= control target key start
LH: loop header
LB: loop body
LE: loop exit
PB: predicated region body
PF: predicated region fallthrough
CT: control target
= control target key end

     0   :  { %12 = vsyncpa [#allocation3], 0  ;;  %s386_s0 = inlined_call_operand.hbm [shape: f32[8,128], index: 0, kind: input, shape index: {}]   ;;  %s387_s1 = inlined_call_operand.hbm [shape: f32[8,128], index: 1, kind: input, shape index: {}]   ;;  %s388_s2 = inlined_call_operand.hbm [shape: f32[8,128], index: 2, kind: input, shape index: {}]   ;;  %s389_s3 = inlined_call_operand.vmem [shape: f32[8,128], index: 3, kind: input, shape index: {}]   ;;  %s390_s4 = inlined_call_operand.hbm [shape: f32[8,128], index: 4, kind: input, shape index: {}]   ;;  %s391_s5 = inlined_call_operand.hbm [shape: f32[8,128], index: 5, kind: output, shape index: {0}]   ;;  %s392_s6 = inlined_call_operand.hbm [shape: f32[1,1], index: 6, kind: output, shape index: {1}]  }
   0x1   :  { %13 = vsyncpa [#allocation7], 0 }
   0x2   :  { %14 = vsyncpa [#allocation10], 0 }
   0x3   :  { %15 = vsyncpa [#allocation4], 0 }
   0x4   :  { %16 = vsyncpa [#allocation5], 0  ;;  %s270_s21 = smov [#allocation6]   ;;  %s271_s23 = smov [#allocation2]  }
   0x5   :  { %s33_s22 = sshll.u32 %s270_s21, 4  ;;  %s23_s24 = sshll.u32 %s271_s23, 4  ;;  %s34_s22 = int_to_ptr.vmem [resolvable:$true] %s33_s22  ;;  %s24_s24 = int_to_ptr.vmem [resolvable:$true] %s23_s24 }
   0x6   :  { %s140_s27 = scalar_lea.hbm %s387_s1, 128 }
   0x7   :  { %p141_p0 = scmp.ne.s32.totalorder %s387_s1, %s140_s27  ;;  %p144_p1 = scmp.lt.u32.totalorder %s140_s27, %s387_s1 }
   0x9   :  { %p146_p2 = pnand %p144_p1, %p141_p0 }
   0xb   :  { %149 = shalt.err (!%p146_p2)
}
   0xc   :  { %s150_s8 = scalar_lea.vmem %s34_s22, 128  ;;  %p155_p4 = scmp.lt.s32.totalorder %s34_s22, %s34_s22 }
   0xd   :  { %p151_p3 = scmp.ne.s32.totalorder %s34_s22, %s150_s8  ;;  %p156_p5 = scmp.lt.s32.totalorder %s150_s8, %s150_s8 }
   0xf   :  { %p157_p6 = por %p156_p5, %p155_p4 }
  0x11   :  { %p158_p7 = pnand %p157_p6, %p151_p3 }
  0x13   :  { %161 = shalt.err (!%p158_p7)
}
  0x14   :  { %36 = dma.hbm_to_vmem [thread:$0]  %s387_s1, 128, %s34_s22, [#allocation7]  }
  0x15   :  { %s162_s13 = scalar_lea.hbm %s386_s0, 128 }
  0x16   :  { %p163_p8 = scmp.ne.s32.totalorder %s386_s0, %s162_s13  ;;  %p166_p9 = scmp.lt.u32.totalorder %s162_s13, %s386_s0 }
  0x18   :  { %p168_p10 = pnand %p166_p9, %p163_p8 }
  0x1a   :  { %171 = shalt.err (!%p168_p10)
}
  0x1b   :  { %s172_s18 = scalar_lea.vmem %s24_s24, 128  ;;  %p177_p12 = scmp.lt.s32.totalorder %s24_s24, %s24_s24 }
  0x1c   :  { %p173_p11 = scmp.ne.s32.totalorder %s24_s24, %s172_s18  ;;  %p178_p13 = scmp.lt.s32.totalorder %s172_s18, %s172_s18 }
  0x1e   :  { %p179_p0 = por %p178_p13, %p177_p12 }
  0x20   :  { %p180_p1 = pnand %p179_p0, %p173_p11 }
  0x22   :  { %183 = shalt.err (!%p180_p1)
}
  0x23   :  { %26 = dma.hbm_to_vmem [thread:$0]  %s386_s0, 128, %s24_s24, [#allocation3]  }
  0x24   :  { %s272_s20 = smov [#allocation8]   ;;  %s273_s22 = smov [#allocation9]  }
  0x25   :  { %s43_s21 = sshll.u32 %s272_s20, 4  ;;  %s55_s23 = sshll.u32 %s273_s22, 4  ;;  %s44_s21 = int_to_ptr.vmem [resolvable:$true] %s43_s21  ;;  %s56_s23 = int_to_ptr.vmem [resolvable:$true] %s55_s23 }
  0x26   :  { %s184_s27 = scalar_lea.hbm %s388_s2, 128 }
  0x27   :  { %p185_p2 = scmp.ne.s32.totalorder %s388_s2, %s184_s27  ;;  %p188_p3 = scmp.lt.u32.totalorder %s184_s27, %s388_s2 }
  0x29   :  { %p190_p4 = pnand %p188_p3, %p185_p2 }
  0x2b   :  { %193 = shalt.err (!%p190_p4)
}
  0x2c   :  { %s194_s0 = scalar_lea.vmem %s44_s21, 128  ;;  %p199_p6 = scmp.lt.s32.totalorder %s44_s21, %s44_s21 }
  0x2d   :  { %p195_p5 = scmp.ne.s32.totalorder %s44_s21, %s194_s0  ;;  %p200_p7 = scmp.lt.s32.totalorder %s194_s0, %s194_s0 }
  0x2f   :  { %p201_p8 = por %p200_p7, %p199_p6 }
  0x31   :  { %p202_p9 = pnand %p201_p8, %p195_p5 }
  0x33   :  { %205 = shalt.err (!%p202_p9)
}
  0x34   :  { %46 = dma.hbm_to_vmem [thread:$0]  %s388_s2, 128, %s44_s21, [#allocation7]  }
  0x35   :  { %s206_s11 = scalar_lea.hbm %s390_s4, 128 }
  0x36   :  { %p207_p10 = scmp.ne.s32.totalorder %s390_s4, %s206_s11  ;;  %p210_p11 = scmp.lt.u32.totalorder %s206_s11, %s390_s4 }
  0x38   :  { %p212_p12 = pnand %p210_p11, %p207_p10 }
  0x3a   :  { %215 = shalt.err (!%p212_p12)
}
  0x3b   :  { %s216_s16 = scalar_lea.vmem %s56_s23, 128  ;;  %p221_p0 = scmp.lt.s32.totalorder %s56_s23, %s56_s23 }
  0x3c   :  { %p217_p13 = scmp.ne.s32.totalorder %s56_s23, %s216_s16  ;;  %p222_p1 = scmp.lt.s32.totalorder %s216_s16, %s216_s16 }
  0x3e   :  { %p223_p2 = por %p222_p1, %p221_p0 }
  0x40   :  { %p224_p3 = pnand %p223_p2, %p217_p13 }
  0x42   :  { %227 = shalt.err (!%p224_p3)
}
  0x43   :  { %58 = dma.hbm_to_vmem [thread:$0]  %s390_s4, 128, %s56_s23, [#allocation10]  }
  0x44   :  { %260 = dma.done.wait [#allocation3], 128  }
  0x45   :  { %261 = vsyncadd [#allocation3], 4294967168 }
  0x46   :  { %262 = dma.done.wait [#allocation7], 256  }
  0x47   :  { %263 = vsyncadd [#allocation7], 4294967040 }
  0x48   :  { %264 = dma.done.wait [#allocation10], 128  }
  0x49   :  { %265 = vsyncadd [#allocation10], 4294967168  ;;  %v72_v0 = vld [vmem:[#allocation6] sm:$0xff]  ;;  %v71_v2 = vld [vmem:[#allocation2] sm:$0xff]  ;;  %s274_s4 = smov [#allocation11]  }
  0x4a   :  { %v76_v1 = vmul.f32 1.442695, %v72_v0  ;;  %v73_v3 = vld [vmem:[#allocation8] sm:$0xff]  ;;  %v74_v5 = vld [vmem:[%s389_s3] sm:$0xff]  ;;  %v75_v14 = vld [vmem:[#allocation9] sm:$0xff]  ;;  %s106_s19 = sshll.u32 %s274_s4, 4  ;;  %s107_s19 = int_to_ptr.vmem [resolvable:$true] %s106_s19 }
  0x4b   :  { %v82_v4 = vsub.f32 %v71_v2, %v73_v3  ;;  %s228_s20 = scalar_lea.vmem %s107_s19, 128  ;;  %p233_p5 = scmp.lt.s32.totalorder %s107_s19, %s107_s19 }
  0x4c   :  { %138 = vpow2.f32 %v76_v1  ;;  %p229_p4 = scmp.ne.s32.totalorder %s107_s19, %s228_s20  ;;  %p234_p6 = scmp.lt.s32.totalorder %s228_s20, %s228_s20 }
  0x4d   :  { %v83_v6 = vmul.f32 %v82_v4, %v74_v5 }
  0x4e   :  { %p235_p7 = por %p234_p6, %p233_p5 }
  0x4f   :  { %v85_v9 = vmul.f32 %v83_v6, %v83_v6 }
  0x50   :  { %p236_p8 = pnand %p235_p7, %p229_p4 }
  0x56   :  { %v139_v7 = vpop.eup %138 }
  0x57   :  { %v81_v8 = vmul.f32 %v139_v7, %v74_v5  ;;  %v78_v15 = vmul.f32 %v139_v7, %v75_v14 }
  0x59   :  { %v84_v10 = vmul.f32 %v81_v8, %v81_v8  ;;  %v79_v16 = vadd.f32 %v78_v15, %v71_v2 }
  0x5b   :  { %v86_v11 = vadd.f32 %v85_v9, %v84_v10  ;;  %80 = vst [vmem:[#allocation11] sm:$0xff] %v79_v16 }
  0x5d   :  { %v87_v12 = vmul.f32 0.5, %v86_v11 }
  0x5f   :  { %v88_v13 = vsub.f32 %v87_v12, %v72_v0 }
  0x61   :  { %89 = vadd.xlane.f32.xlu0 %v88_v13 }
  0x62   :  { %239 = shalt.err (!%p236_p8)
}
  0x63   :  { %s240_s22 = scalar_lea.hbm %s391_s5, 128 }
  0x64   :  { %p241_p9 = scmp.ne.s32.totalorder %s391_s5, %s240_s22  ;;  %p244_p10 = scmp.lt.u32.totalorder %s240_s22, %s391_s5 }
  0x66   :  { %p246_p11 = pnand %p244_p10, %p241_p9 }
  0x68   :  { %249 = shalt.err (!%p246_p11)
}
  0x69   :  { %109 = dma.vmem_to_hbm [thread:$0]  %s107_s19, 128, %s391_s5, [#allocation4]  }
  0x6a   :  { %s250_s24 = scalar_lea.hbm %s392_s6, 16 }
  0x6b   :  { %p251_p12 = scmp.ne.s32.totalorder %s392_s6, %s250_s24  ;;  %p254_p13 = scmp.lt.u32.totalorder %s250_s24, %s392_s6 }
  0x6d   :  { %p256_p0 = pnand %p254_p13, %p251_p12 }
  0xee   :  { %v90_v17 = vpop.xlane.xlu0 %89 }
  0xef   :  { %v91_v18 = vrot.slane %v90_v17, 4 }
  0xf1   :  { %v92_v19 = vadd.f32 %v91_v18, %v90_v17 }
  0xf3   :  { %v93_v20 = vrot.slane %v92_v19, 2 }
  0xf5   :  { %v94_v21 = vadd.f32 %v93_v20, %v92_v19 }
  0xf7   :  { %v95_v22 = vrot.slane %v94_v21, 1 }
  0xf9   :  { %v96_v23 = vadd.f32 %v95_v22, %v94_v21 }
  0xfb   :  { %130 = vpush %v96_v23 }
 0x12c   :  { %s131_s30 = spop %130 }
 0x12d   :  { %99 = sst [smem:[#allocation12]] %s131_s30 }
 0x12e   :  { %259 = shalt.err (!%p256_p0)
}
 0x12f   :  { %s275_s11 = smov [#allocation12]  }
 0x130   :  { %117 = dma.smem_to_hbm %s275_s11, 16, %s392_s6, [#allocation5]  }
 0x131   :  { %266 = dma.done.wait [#allocation4], 128  }
 0x132   :  { %267 = vsyncadd [#allocation4], 4294967168 }
 0x133   :  { %268 = dma.done.wait [#allocation5], 16  }
 0x134   :  { %269 = vsyncadd [#allocation5], 4294967280 }
 0x135   :  { %124 = sfence }
 0x136   :  { %125 = vsyncpa [#allocation3], 1 }
 0x137   :  { %126 = vsyncpa [#allocation7], 1 }
 0x138   :  { %127 = vsyncpa [#allocation10], 1 }
 0x139   :  { %128 = vsyncpa [#allocation4], 1 }
 0x13a   :  { %129 = vsyncpa [#allocation5], 1 }

</bundles_post_ra>
